<compile_context>
chip_gen: v5e
topology: v5e:2x2
jax: 0.10.0
libtpu: 0.0.40
codegen_flags: <defaults>
</compile_context>

<pallas_src>
import functools

import jax
import jax.numpy as jnp
from jax.experimental import pallas as pl
from jax.experimental.pallas import tpu as pltpu


def _dice_kernel(x_ref, lbl_ref, ign_ref,
                 inter_ref, ysum_ref, zsum_ref, *, hw, tile_p):
    """One (n, j) grid step: per-class partial sums over a (C, TILE_P) tile."""
    j = pl.program_id(1)

    x = x_ref[...].astype(jnp.float32)                  # (C, TP) logits
    C, TP = x.shape

    # keep mask: pixel used iff ignore != 1 and (for the ragged tail) in-bounds
    valid = ign_ref[...] != 1                           # (1, TP) bool
    if hw % tile_p != 0:                                # static: only if ragged
        lane = jax.lax.broadcasted_iota(jnp.int32, (1, TP), 1)
        in_bounds = (j * TP + lane) < hw                # (1, TP)
        valid = valid & in_bounds
        # zero padded lanes so exp never sees garbage (inf/NaN-safe)
        x = jnp.where(in_bounds, x, 0.0)

    # softmax over the channel (sublane) axis == torch.softmax(inputs, dim=1)
    m = jnp.max(x, axis=0, keepdims=True)               # (1, TP)
    e = jnp.exp(x - m)                                   # (C, TP)
    denom = jnp.sum(e, axis=0, keepdims=True)            # (1, TP)
    s = e * pl.reciprocal(denom, approx=False)           # exact: free at 1/C rate

    # One-hot(target) restricted to kept pixels.  t, keep are {0,1} so
    # target*target == target and the mask squares to itself.
    onehot = jax.lax.broadcasted_iota(jnp.int32, (C, TP), 0) == lbl_ref[...]
    t_mask = onehot & valid                              # (C, TP) bool

    # Mask BEFORE the lane reduction, then write (C, 1) partials for this tile.
    inter_ref[...] = jnp.sum(jnp.where(t_mask, s, 0.0), axis=1, keepdims=True)
    ysum_ref[...] = jnp.sum(t_mask.astype(jnp.float32), axis=1, keepdims=True)
    zsum_ref[...] = jnp.sum(jnp.where(valid, s * s, 0.0), axis=1, keepdims=True)


@functools.partial(jax.jit, static_argnames=("n_classes", "tile"))
def dice_loss(inputs, target, weight, ignore, *, n_classes, tile=32768):
    """Pallas Dice loss.

    inputs: (N, C, H, W) float logits (f32 or bf16; softmax applied in-kernel)
    target: (N, 1, H, W) integer class labels
    weight: (C,) float per-class weights
    ignore: (N, 1, H, W) int/float; pixels where ignore == 1 are excluded
    """
    N, C, H, W = inputs.shape
    assert C == n_classes
    HW = H * W

    # Pure reshapes only -- no transpose, no pad, no dtype widening of logits.
    x = inputs.reshape(N, C, HW)
    lbl = target.reshape(N, 1, HW).astype(jnp.int32)
    ign = ignore.reshape(N, 1, HW).astype(jnp.int32)
    # TODO(synk): labels/ignore could be carried as int8 (or merged) if the
    # producer emits them narrow; a standalone cast here is a wash.

    if HW <= tile:
        tile_p = HW                      # full row; always a legal block
    else:
        tile_p = tile
        assert tile_p % 128 == 0, "pixel tile must be lane-aligned"
    num_j = pl.cdiv(HW, tile_p)

    kernel = functools.partial(_dice_kernel, hw=HW, tile_p=tile_p)

    # Per-(n, j) partials: tiny outputs, no carried state -> both axes parallel.
    out_sds = jax.ShapeDtypeStruct((N, num_j, C, 1), jnp.float32)
    px_spec = pl.BlockSpec((None, C, tile_p), lambda n, j: (n, 0, j))
    sc_spec = pl.BlockSpec((None, 1, tile_p), lambda n, j: (n, 0, j))
    out_spec = pl.BlockSpec((None, None, C, 1), lambda n, j: (n, j, 0, 0))

    inter_p, ysum_p, zsum_p = pl.pallas_call(
        kernel,
        out_shape=(out_sds, out_sds, out_sds),
        grid_spec=pltpu.PrefetchScalarGridSpec(
            num_scalar_prefetch=0,
            grid=(N, num_j),
            in_specs=[px_spec, sc_spec, sc_spec],
            out_specs=(out_spec, out_spec, out_spec),
        ),
        compiler_params=pltpu.CompilerParams(
            dimension_semantics=("parallel", "parallel")),
    )(x, lbl, ign)

    # Tiny epilogue on (N, num_j, C) partials: combine, form dice, weight.
    smooth = 1e-5
    inter = jnp.sum(inter_p[..., 0], axis=(0, 1))       # (C,)
    y_sum = jnp.sum(ysum_p[..., 0], axis=(0, 1))
    z_sum = jnp.sum(zsum_p[..., 0], axis=(0, 1))
    dice = 1.0 - (2.0 * inter + smooth) / (z_sum + y_sum + smooth)
    w = weight.astype(jnp.float32).reshape(n_classes)
    return jnp.sum(dice * w) / n_classes


def dice_loss_ref(inputs, target, weight, ignore, n_classes):
    """Pure-JAX reference mirroring the PyTorch module (ignore mask excludes)."""
    s = jax.nn.softmax(inputs.astype(jnp.float32), axis=1)   # (N, C, H, W)
    onehot = jax.nn.one_hot(target[:, 0], n_classes, axis=1, dtype=jnp.float32)
    keep = (ignore != 1).astype(jnp.float32)                  # (N, 1, H, W)
    smooth = 1e-5
    loss = 0.0
    for i in range(n_classes):
        sc = s[:, i] * keep[:, 0]
        tg = onehot[:, i] * keep[:, 0]
        inter = jnp.sum(sc * tg)
        y_sum = jnp.sum(tg * tg)
        z_sum = jnp.sum(sc * sc)
        dice = 1.0 - (2.0 * inter + smooth) / (z_sum + y_sum + smooth)
        loss = loss + dice * weight[i]
    return loss / n_classes


def _run_case(key, N, n_classes, H, W, tile):
    k1, k2, k3 = jax.random.split(key, 3)
    inputs = jax.random.normal(k1, (N, n_classes, H, W), dtype=jnp.float32)
    target = jax.random.randint(k2, (N, 1, H, W), 0, n_classes, dtype=jnp.int32)
    weight = jnp.ones((n_classes,), dtype=jnp.float32)
    ignore = (jax.random.uniform(k3, (N, 1, H, W)) < 0.1).astype(jnp.int32)

    loss = dice_loss(inputs, target, weight, ignore,
                     n_classes=n_classes, tile=tile)
    loss = jax.block_until_ready(loss)
    ref = dice_loss_ref(inputs, target, weight, ignore, n_classes)
    assert jnp.allclose(loss, ref, rtol=1e-4, atol=1e-6), (loss, ref)


if __name__ == "__main__":
    key = jax.random.PRNGKey(0)
    k_a, k_b = jax.random.split(key)

    # Small canonical case: single tile per batch row.
    _run_case(k_a, N=2, n_classes=4, H=16, W=16, tile=32768)

    # Multi-tile case with a ragged trailing tile (HW=320, tile=256) to
    # exercise the in-kernel lane mask and pixel-axis partials.
    _run_case(k_b, N=2, n_classes=4, H=16, W=20, tile=256)

    print("KERNEL_OK")
</pallas_src>

<mosaic_0001>
module attributes {stable_mosaic.version = 11 : i64} {
  func.func @_dice_kernel(%arg0: i32, %arg1: i32, %arg2: memref<1x4x256xf32, #tpu.memory_space<vmem>>, %arg3: memref<1x1x256xi32, #tpu.memory_space<vmem>>, %arg4: memref<1x1x256xi32, #tpu.memory_space<vmem>>, %arg5: memref<1x1x4x1xf32, #tpu.memory_space<vmem>>, %arg6: memref<1x1x4x1xf32, #tpu.memory_space<vmem>>, %arg7: memref<1x1x4x1xf32, #tpu.memory_space<vmem>>) attributes {dimension_semantics = [#tpu.dimension_semantics<parallel>, #tpu.dimension_semantics<parallel>], iteration_bounds = array<i64: 2, 1>, scalar_prefetch = 0 : i64, scratch_operands = 0 : i64, tpu.core_type = #tpu.core_type<tc>, window_params = [{transform_indices = @transform_0, window_bounds = array<i64: 1, 4, 256>}, {transform_indices = @transform_1, window_bounds = array<i64: 1, 1, 256>}, {transform_indices = @transform_2, window_bounds = array<i64: 1, 1, 256>}, {transform_indices = @transform_3, window_bounds = array<i64: 1, 1, 4, 1>}, {transform_indices = @transform_4, window_bounds = array<i64: 1, 1, 4, 1>}, {transform_indices = @transform_5, window_bounds = array<i64: 1, 1, 4, 1>}]} {
    %c0 = arith.constant 0 : index
    %c0_0 = arith.constant 0 : index
    %c0_1 = arith.constant 0 : index
    %0 = vector.load %arg2[%c0, %c0_0, %c0_1] : memref<1x4x256xf32, #tpu.memory_space<vmem>>, vector<1x4x256xf32>
    %1 = vector.shape_cast %0 : vector<1x4x256xf32> to vector<4x256xf32>
    %c0_2 = arith.constant 0 : index
    %c0_3 = arith.constant 0 : index
    %c0_4 = arith.constant 0 : index
    %2 = vector.load %arg4[%c0_2, %c0_3, %c0_4] : memref<1x1x256xi32, #tpu.memory_space<vmem>>, vector<1x1x256xi32>
    %3 = vector.shape_cast %2 : vector<1x1x256xi32> to vector<1x256xi32>
    %c1_i32 = arith.constant 1 : i32
    %4 = vector.broadcast %c1_i32 : i32 to vector<1x256xi32>
    %5 = arith.cmpi ne, %3, %4 : vector<1x256xi32>
    %cst = arith.constant dense<0xFF800000> : vector<256xf32>
    %6 = vector.multi_reduction <maximumf>, %1, %cst [0] : vector<4x256xf32> to vector<256xf32>
    %7 = vector.shape_cast %6 : vector<256xf32> to vector<1x256xf32>
    %8 = vector.broadcast %7 : vector<1x256xf32> to vector<4x256xf32>
    %9 = arith.subf %1, %8 : vector<4x256xf32>
    %10 = math.exp %9 : vector<4x256xf32>
    %cst_5 = arith.constant dense<0.000000e+00> : vector<256xf32>
    %11 = vector.multi_reduction <add>, %10, %cst_5 [0] : vector<4x256xf32> to vector<256xf32>
    %12 = vector.shape_cast %11 : vector<256xf32> to vector<1x256xf32>
    %13 = tpu.reciprocal %12 : vector<1x256xf32> -> vector<1x256xf32>
    %14 = vector.broadcast %13 : vector<1x256xf32> to vector<4x256xf32>
    %15 = arith.mulf %10, %14 : vector<4x256xf32>
    %16 = tpu.iota {dimensions = array<i32: 0>} : vector<4x256xi32>
    %c0_6 = arith.constant 0 : index
    %c0_7 = arith.constant 0 : index
    %c0_8 = arith.constant 0 : index
    %17 = vector.load %arg3[%c0_6, %c0_7, %c0_8] : memref<1x1x256xi32, #tpu.memory_space<vmem>>, vector<1x1x256xi32>
    %18 = vector.shape_cast %17 : vector<1x1x256xi32> to vector<1x256xi32>
    %19 = vector.broadcast %18 : vector<1x256xi32> to vector<4x256xi32>
    %20 = arith.cmpi eq, %16, %19 : vector<4x256xi32>
    %21 = vector.broadcast %5 : vector<1x256xi1> to vector<4x256xi1>
    %22 = arith.andi %20, %21 : vector<4x256xi1>
    %cst_9 = arith.constant 0.000000e+00 : f32
    %23 = vector.broadcast %cst_9 : f32 to vector<4x256xf32>
    %24 = arith.select %22, %15, %23 : vector<4x256xi1>, vector<4x256xf32>
    %cst_10 = arith.constant dense<0.000000e+00> : vector<4xf32>
    %25 = vector.multi_reduction <add>, %24, %cst_10 [1] : vector<4x256xf32> to vector<4xf32>
    %26 = vector.shape_cast %25 : vector<4xf32> to vector<4x1xf32>
    %c0_11 = arith.constant 0 : index
    %c0_12 = arith.constant 0 : index
    %c0_13 = arith.constant 0 : index
    %c0_14 = arith.constant 0 : index
    %27 = vector.load %arg5[%c0_11, %c0_12, %c0_13, %c0_14] : memref<1x1x4x1xf32, #tpu.memory_space<vmem>>, vector<1x1x4x1xf32>
    %28 = vector.shape_cast %27 : vector<1x1x4x1xf32> to vector<4x1xf32>
    %29 = vector.shape_cast %26 : vector<4x1xf32> to vector<1x1x4x1xf32>
    tpu.vector_store %arg5[%c0_11, %c0_12, %c0_13, %c0_14], %29 {strides = array<i32>} : memref<1x1x4x1xf32, #tpu.memory_space<vmem>>, vector<1x1x4x1xf32>,
    %30 = arith.extui %22 : vector<4x256xi1> to vector<4x256xi32>
    %31 = arith.sitofp %30 : vector<4x256xi32> to vector<4x256xf32>
    %cst_15 = arith.constant dense<0.000000e+00> : vector<4xf32>
    %32 = vector.multi_reduction <add>, %31, %cst_15 [1] : vector<4x256xf32> to vector<4xf32>
    %33 = vector.shape_cast %32 : vector<4xf32> to vector<4x1xf32>
    %c0_16 = arith.constant 0 : index
    %c0_17 = arith.constant 0 : index
    %c0_18 = arith.constant 0 : index
    %c0_19 = arith.constant 0 : index
    %34 = vector.load %arg6[%c0_16, %c0_17, %c0_18, %c0_19] : memref<1x1x4x1xf32, #tpu.memory_space<vmem>>, vector<1x1x4x1xf32>
    %35 = vector.shape_cast %34 : vector<1x1x4x1xf32> to vector<4x1xf32>
    %36 = vector.shape_cast %33 : vector<4x1xf32> to vector<1x1x4x1xf32>
    tpu.vector_store %arg6[%c0_16, %c0_17, %c0_18, %c0_19], %36 {strides = array<i32>} : memref<1x1x4x1xf32, #tpu.memory_space<vmem>>, vector<1x1x4x1xf32>,
    %37 = arith.mulf %15, %15 : vector<4x256xf32>
    %cst_20 = arith.constant 0.000000e+00 : f32
    %38 = vector.shape_cast %5 : vector<1x256xi1> to vector<1x256xi1>
    %39 = vector.broadcast %38 : vector<1x256xi1> to vector<4x256xi1>
    %40 = vector.broadcast %cst_20 : f32 to vector<4x256xf32>
    %41 = arith.select %39, %37, %40 : vector<4x256xi1>, vector<4x256xf32>
    %cst_21 = arith.constant dense<0.000000e+00> : vector<4xf32>
    %42 = vector.multi_reduction <add>, %41, %cst_21 [1] : vector<4x256xf32> to vector<4xf32>
    %43 = vector.shape_cast %42 : vector<4xf32> to vector<4x1xf32>
    %c0_22 = arith.constant 0 : index
    %c0_23 = arith.constant 0 : index
    %c0_24 = arith.constant 0 : index
    %c0_25 = arith.constant 0 : index
    %44 = vector.load %arg7[%c0_22, %c0_23, %c0_24, %c0_25] : memref<1x1x4x1xf32, #tpu.memory_space<vmem>>, vector<1x1x4x1xf32>
    %45 = vector.shape_cast %44 : vector<1x1x4x1xf32> to vector<4x1xf32>
    %46 = vector.shape_cast %43 : vector<4x1xf32> to vector<1x1x4x1xf32>
    tpu.vector_store %arg7[%c0_22, %c0_23, %c0_24, %c0_25], %46 {strides = array<i32>} : memref<1x1x4x1xf32, #tpu.memory_space<vmem>>, vector<1x1x4x1xf32>,
    return
  }
  func.func @transform_0(%arg0: i32, %arg1: i32) -> (i32, i32, i32) {
    %c0_i32 = arith.constant 0 : i32
    %c0_i32_0 = arith.constant 0 : i32
    return %arg0, %c0_i32, %arg1 : i32, i32, i32
  }
  func.func @transform_1(%arg0: i32, %arg1: i32) -> (i32, i32, i32) {
    %c0_i32 = arith.constant 0 : i32
    %c0_i32_0 = arith.constant 0 : i32
    return %arg0, %c0_i32, %arg1 : i32, i32, i32
  }
  func.func @transform_2(%arg0: i32, %arg1: i32) -> (i32, i32, i32) {
    %c0_i32 = arith.constant 0 : i32
    %c0_i32_0 = arith.constant 0 : i32
    return %arg0, %c0_i32, %arg1 : i32, i32, i32
  }
  func.func @transform_3(%arg0: i32, %arg1: i32) -> (i32, i32, i32, i32) {
    %c0_i32 = arith.constant 0 : i32
    %c0_i32_0 = arith.constant 0 : i32
    %c0_i32_1 = arith.constant 0 : i32
    return %arg0, %arg1, %c0_i32, %c0_i32_0 : i32, i32, i32, i32
  }
  func.func @transform_4(%arg0: i32, %arg1: i32) -> (i32, i32, i32, i32) {
    %c0_i32 = arith.constant 0 : i32
    %c0_i32_0 = arith.constant 0 : i32
    %c0_i32_1 = arith.constant 0 : i32
    return %arg0, %arg1, %c0_i32, %c0_i32_0 : i32, i32, i32, i32
  }
  func.func @transform_5(%arg0: i32, %arg1: i32) -> (i32, i32, i32, i32) {
    %c0_i32 = arith.constant 0 : i32
    %c0_i32_0 = arith.constant 0 : i32
    %c0_i32_1 = arith.constant 0 : i32
    return %arg0, %arg1, %c0_i32, %c0_i32_0 : i32, i32, i32, i32
  }
}

</mosaic_0001>

<bundles_post_ra>
// kernel: dice_loss.1
= control target key start
LH: loop header
LB: loop body
LE: loop exit
PB: predicated region body
PF: predicated region fallthrough
CT: control target
= control target key end

     0   :  { %s796_s18 = smov 0   ;;  %s798_s19 = smov 0   ;;  %s887_s0 = inlined_call_operand.vmem [shape: f32[2,4,256], index: 0, kind: input, shape index: {}]   ;;  %s888_s1 = inlined_call_operand.vmem [shape: s32[2,1,256], index: 1, kind: input, shape index: {}]   ;;  %s889_s2 = inlined_call_operand.vmem [shape: s32[2,1,256], index: 2, kind: input, shape index: {}]   ;;  %s890_s3 = inlined_call_operand.vmem [shape: f32[2,1,4,1], index: 3, kind: output, shape index: {0}]   ;;  %s891_s4 = inlined_call_operand.vmem [shape: f32[2,1,4,1], index: 4, kind: output, shape index: {1}]   ;;  %s892_s5 = inlined_call_operand.vmem [shape: f32[2,1,4,1], index: 5, kind: output, shape index: {2}]  }
   0x1   :  { %s800_s20 = smov 0  }
   0x2 LB: > { %s28_s21 = sadd.s32 1, %s758_s19  ;;  %p695_p0 = scmp.ge.s32.totalorder %s762_s20, 1  ;;  %s762_s20 = sphi %s800_s20, %s16_s20   ;;  %s758_s19 = sphi %s798_s19, %s902_s19   ;;  %s754_s18 = sphi %s796_s18, %s901_s18  }
   0x3   : > { %p30_p1 = scmp.ge.s32.totalorder %s28_s21, 2  ;;  %p249_p2 = scmp.lt.s32.totalorder %s762_s20, 3 }
   0x5   : > { %s904_s21 = smov (%p30_p1, %s28_s21), 0  ;;  %p250_p3 = pnand %p695_p0, %p249_p2 }
   0x6   : > { %p314_p4 = scmp.lt.s32.totalorder (!%p250_p3), %s754_s18, 1 }
   0x7   : > { %253 = sbr.rel (%p250_p3) target bundleno = 233 (0xe9), region = 32 }
   0xc   : > { %s906_s18 = smov (!%p314_p4, %s754_s18), 1  ;;  %vm371_vm0 = vcmask 1043456   ;;  %v448_v57 = vlaneseq  ;;  %v764_v61 = vmov 0  }
   0xd   : > { %s707_s22 = sshll.u32 %s906_s18, 3  ;;  %s698_s26 = sshll.u32 %s906_s18, 1 }
   0xe   : > { %s321_s25 = scalar_lea.vmem %s887_s0, %s707_s22  ;;  %s339_s29 = scalar_lea.vmem %s889_s2, %s698_s26 }
   0xf   : > { %v362_v0 = vld [vmem:[%s321_s25] sm:$0xff]  ;;  %s330_s7 = scalar_lea.vmem %s888_s1, %s698_s26  ;;  %s700_s8 = sshll.u32 %s906_s18, 2 }
  0x10   : > { %366 = vst [vmem:[#allocation1] ss:$2 sm:$0xff] %v362_v0  ;;  %v363_v46 = vld [vmem:[%s339_s29] sm:$0x3]  ;;  %s347_s11 = scalar_lea.vmem %s890_s3, %s700_s8  ;;  %s361_s14 = scalar_lea.vmem %s892_s5, %s700_s8 }
  0x11   : > { %vm364_vm6 = vcmp.ne.s32.totalorder %v363_v46, 1  ;;  %v450_v60 = vld [vmem:[%s330_s7] sm:$0x3]  ;;  %s354_s17 = scalar_lea.vmem %s891_s4, %s700_s8 }
  0x12   : > { %v455_v62 = vsel %vm364_vm6, 1, %v764_v61 }
  0x17   : > { %v367_v1 = vld.sshfl [vmem:[#allocation1] sm:$0xff pattern:$0x75316420]  ;;  %v368_v2 = vld.sshfl [vmem:[#allocation1 + $0x8] sm:$0xff pattern:$0x75316420] }
  0x18   : > { %v372_v3 = vsel %vm371_vm0, %v367_v1, -inf  ;;  %v379_v4 = vsel %vm371_vm0, %v368_v2, -inf  ;;  %v449_v1 = vshrl.u32 %v448_v57, 7  ;;  %v451_v2 = vperm.slane %v450_v60, 0 }
  0x19   : > { %v373_v5 = vrot.slane %v372_v3, 4  ;;  %v380_v6 = vrot.slane %v379_v4, 4 }
  0x1a   : > { %vm834_vm10 = vcmp.eq.s32.totalorder %v449_v1, %v451_v2 }
  0x1b   : > { %v374_v7 = vmax.f32 %v372_v3, %v373_v5  ;;  %v381_v8 = vmax.f32 %v379_v4, %v380_v6  ;;  %v456_v3 = vperm.slane %v455_v62, 0  ;;  %v452_v5 = vperm.slane %v450_v60, 1 }
  0x1c   : > { %v457_v6 = vperm.slane %v455_v62, 1 }
  0x1d   : > { %v375_v9 = vrot.slane %v374_v7, 2  ;;  %v382_v10 = vrot.slane %v381_v8, 2  ;;  %vm838_vm11 = vcmp.eq.s32.totalorder %v456_v3, 1  ;;  %vm842_vm12 = vcmp.eq.s32.totalorder %v449_v1, %v452_v5 }
  0x1e   : > { %vm846_vm13 = vcmp.eq.s32.totalorder %v457_v6, 1  ;;  %vm460_vm14 = vmand %vm834_vm10, %vm838_vm11 }
  0x1f   : > { %v376_v11 = vmax.f32 %v374_v7, %v375_v9  ;;  %v383_v12 = vmax.f32 %v381_v8, %v382_v10  ;;  %vm461_vm15 = vmand %vm842_vm12, %vm846_vm13 }
  0x21   : > { %v377_v13 = vrot.slane %v376_v11, 1  ;;  %v384_v14 = vrot.slane %v383_v12, 1 }
  0x23   : > { %v378_v15 = vmax.f32 %v376_v11, %v377_v13  ;;  %v385_v16 = vmax.f32 %v383_v12, %v384_v14 }
  0x25   : > { %v388_v17 = vrot.slane %v385_v16, 4 }
  0x27   : > { %v389_v18 = vsel %vm371_vm0, %v378_v15, %v388_v17 }
  0x28   : > { %v391_v19 = vsub.f32 %v362_v0, %v389_v18 }
  0x2a   : > { %v392_v20 = vmul.f32 1.442695, %v391_v19  ;;  %v765_v19 = vmov 0.0  }
  0x2c   : > { %734 = vpow2.f32 %v392_v20  ;;  %v703_v20 = vsel %vm460_vm14, 1.0, %v765_v19 }
  0x32   : > { %v735_v21 = vpop.eup %734 }
  0x33   : > { %395 = vst [vmem:[#allocation1] ss:$2 sm:$0xff] %v735_v21 }
  0x3a   : > { %v396_v22 = vld.sshfl [vmem:[#allocation1] sm:$0xff pattern:$0x75316420]  ;;  %v397_v23 = vld.sshfl [vmem:[#allocation1 + $0x8] sm:$0xff pattern:$0x75316420] }
  0x3b   : > { %v400_v24 = vsel %vm371_vm0, %v396_v22, 0.0  ;;  %v407_v25 = vsel %vm371_vm0, %v397_v23, 0.0  ;;  %v481_v22 = vsel %vm371_vm0, %v703_v20, 0.0 }
  0x3c   : > { %v401_v26 = vrot.slane %v400_v24, 4  ;;  %v408_v27 = vrot.slane %v407_v25, 4 }
  0x3e   : > { %v402_v28 = vadd.f32 %v401_v26, %v400_v24  ;;  %v409_v29 = vadd.f32 %v408_v27, %v407_v25 }
  0x40   : > { %v403_v30 = vrot.slane %v402_v28, 2  ;;  %v410_v31 = vrot.slane %v409_v29, 2 }
  0x42   : > { %v404_v32 = vadd.f32 %v403_v30, %v402_v28  ;;  %v411_v33 = vadd.f32 %v410_v31, %v409_v29 }
  0x44   : > { %v405_v34 = vrot.slane %v404_v32, 1  ;;  %v412_v35 = vrot.slane %v411_v33, 1 }
  0x46   : > { %v406_v36 = vadd.f32 %v405_v34, %v404_v32  ;;  %v413_v37 = vadd.f32 %v412_v35, %v411_v33 }
  0x48   : > { %736 = vrcp.f32 %v406_v36  ;;  %vm419_vm1 = vweird.f32 %v406_v36  ;;  %v423_v41 = vand.u32 2147483647, %v406_v36  ;;  %v425_v44 = vand.u32 2147483648, %v406_v36 }
  0x49   : > { %738 = vrcp.f32 %v413_v37  ;;  %v439_v45 = vand.u32 2147483648, %v413_v37  ;;  %vm433_vm3 = vweird.f32 %v413_v37  ;;  %v437_v48 = vand.u32 2147483647, %v413_v37 }
  0x4a   : > { %v426_v52 = vor.u32 1.1754944e-38, %v425_v44  ;;  %vm424_vm8 = vcmp.eq.f32.partialorder %v423_v41, 8.507059e+37 }
  0x4b   : > { %v440_v53 = vor.u32 1.1754944e-38, %v439_v45  ;;  %vm438_vm9 = vcmp.eq.f32.partialorder %v437_v48, 8.507059e+37 }
  0x4e   : > { %v737_v38 = vpop.eup %736 }
  0x4f   : > { %v739_v39 = vpop.eup %738  ;;  %v415_v40 = vmul.f32 %v737_v38, %v406_v36  ;;  %vm420_vm2 = vweird.f32 %v737_v38 }
  0x50   : > { %v429_v42 = vmul.f32 %v739_v39, %v413_v37  ;;  %vm434_vm4 = vweird.f32 %v739_v39  ;;  %vm421_vm5 = vmor %vm419_vm1, %vm420_vm2  ;;  %vm475_vm1 = vcmask 3072  }
  0x51   : > { %v416_v43 = vsub.f32 1.0, %v415_v40  ;;  %vm435_vm7 = vmor %vm433_vm3, %vm434_vm4 }
  0x52   : > { %v430_v47 = vsub.f32 1.0, %v429_v42 }
  0x53   : > { %v417_v49 = vmul.f32 %v737_v38, %v416_v43 }
  0x54   : > { %v431_v50 = vmul.f32 %v739_v39, %v430_v47 }
  0x55   : > { %v418_v51 = vadd.f32 %v737_v38, %v417_v49 }
  0x56   : > { %v432_v54 = vadd.f32 %v739_v39, %v431_v50 }
  0x57   : > { %v422_v55 = vsel %vm421_vm5, %v737_v38, %v418_v51 }
  0x58   : > { %v436_v56 = vsel %vm435_vm7, %v739_v39, %v432_v54  ;;  %v427_v58 = vsel %vm424_vm8, %v426_v52, %v422_v55 }
  0x59   : > { %v441_v59 = vsel %vm438_vm9, %v440_v53, %v436_v56 }
  0x5a   : > { %v444_v63 = vrot.slane %v441_v59, 4 }
  0x5c   : > { %v445_v0 = vsel %vm371_vm0, %v427_v58, %v444_v63 }
  0x5d   : > { %v447_v4 = vmul.f32 %v735_v21, %v445_v0  ;;  %v704_v21 = vsel %vm461_vm15, 1.0, %v765_v19 }
  0x5e   : > { %v482_v23 = vsel %vm371_vm0, %v704_v21, 0.0 }
  0x5f   : > { %463 = vst [vmem:[#allocation1] ss:$2 sm:$0xff] %v447_v4  ;;  %v487_v11 = vmul.f32 %v447_v4, %v447_v4  ;;  %v483_v28 = vadd.f32 %v482_v23, %v481_v22 }
  0x66   : > { %v464_v12 = vld.sshfl [vmem:[#allocation1] sm:$0xff pattern:$0x75316420]  ;;  %v465_v13 = vld.sshfl [vmem:[#allocation1 + $0x8] sm:$0xff pattern:$0x75316420] }
  0x67   : > { %v468_v14 = vsel %vm460_vm14, %v464_v12, 0.0  ;;  %v469_v15 = vsel %vm461_vm15, %v465_v13, 0.0  ;;  %489 = vst [vmem:[#allocation1] ss:$2 sm:$0xff] %v487_v11 }
  0x68   : > { %v470_v16 = vsel %vm371_vm0, %v468_v14, 0.0  ;;  %v471_v17 = vsel %vm371_vm0, %v469_v15, 0.0 }
  0x69   : > { %v472_v18 = vadd.f32 %v471_v17, %v470_v16 }
  0x6b   : > { %473 = vadd.xlane.f32.xlu0 %v472_v18 }
  0x6e   : > { %v490_v24 = vld.sshfl [vmem:[#allocation1] sm:$0xff pattern:$0x75316420]  ;;  %v491_v25 = vld.sshfl [vmem:[#allocation1 + $0x8] sm:$0xff pattern:$0x75316420] }
  0x6f   : > { %v494_v26 = vsel %vm838_vm11, %v490_v24, 0.0  ;;  %v495_v27 = vsel %vm846_vm13, %v491_v25, 0.0 }
  0x70   : > { %v496_v29 = vsel %vm371_vm0, %v494_v26, 0.0  ;;  %v497_v30 = vsel %vm371_vm0, %v495_v27, 0.0 }
  0x71   : > { %v498_v31 = vadd.f32 %v497_v30, %v496_v29 }
  0x73   : > { %499 = vadd.xlane.f32.xlu1 %v498_v31  ;;  %484 = vadd.xlane.f32.xlu0 %v483_v28 }
  0xde   : > { %v474_v32 = vpop.xlane.xlu0 %473 }
  0xdf   : > { %476 = vst.msk [vmem:[%s347_s11] sm:$0xf] %vm475_vm1, %v474_v32 }
  0xe6   : > { %v500_v33 = vpop.xlane.xlu1 %499  ;;  %v485_v34 = vpop.xlane.xlu0 %484 }
  0xe7   : > { %501 = vst.msk [vmem:[%s361_s14] sm:$0xf] %vm475_vm1, %v500_v33 }
  0xe8   : > { %486 = vst.msk [vmem:[%s354_s17] sm:$0xf] %vm475_vm1, %v485_v34 }
  0xe9 PF: > { %s16_s20 = sadd.s32 1, %s762_s20   ;;  %s901_s18 = smov %s758_s19 }
  0xea   : > { %p13_p5 = scmp.ge.s32.totalorder %s16_s20, 4   ;;  %s902_s19 = smov %s904_s21 }
  0xec   :  { %15 = sbr.rel (!%p13_p5) target bundleno = 2 (0x2), region = 92 }

</bundles_post_ra>
